<compile_context>
chip_gen: v7x
topology: tpu7x:2x2x1
jax: 0.10.0
libtpu: 0.0.40
codegen_flags: <defaults>
</compile_context>

<pallas_src>
import functools

import numpy as np
import jax
import jax.numpy as jnp
from jax.experimental import pallas as pl
from jax.experimental.pallas import tpu as pltpu

BINS = (1, 2, 4)
_LANE = 128
_SUBLANE = 8
_MIN_TM = 256      # smallest row tile we bother with (multiple of 8)
_MAX_TM = 4096     # review: 1024-4096 rows is the sweet spot when HW is small


def _round_up(v, m):
    return ((v + m - 1) // m) * m


@functools.lru_cache(maxsize=1)
def _vmem_capacity_bytes():
    """Per-core VMEM capacity; conservative fallback if the query fails."""
    try:
        return int(pltpu.get_tpu_info().vmem_capacity_bytes)
    except Exception:
        return 64 * 1024 * 1024  # v7x per-TensorCore VMEM (smallest generation)


def _pool_matrix(H, W, bins, pad_cols):
    """Static (H*W, pad_cols) pooling matrix.

    Column k holds 1/|window_k| over window k; window order is
    (bin b in bins, i in range(b), j in range(b)), matching AdaptiveAvgPool2d
    boundaries start=floor(i*H/b), end=ceil((i+1)*H/b) (never empty).
    """
    nb = sum(b * b for b in bins)
    assert pad_cols >= nb
    P = np.zeros((H * W, pad_cols), dtype=np.float32)
    col = 0
    for b in bins:
        for i in range(b):
            hs, he = (i * H) // b, ((i + 1) * H + b - 1) // b
            for j in range(b):
                ws, we = (j * W) // b, ((j + 1) * W + b - 1) // b
                inv = 1.0 / float((he - hs) * (we - ws))
                for h in range(hs, he):
                    P[h * W + ws:h * W + we, col] = inv
                col += 1
    assert col == nb
    return P


def _choose_tiles(NC, HW, pcols, itemsize):
    """Generation-aware, VMEM-budgeted (TM, TK) row/reduction tiles."""
    cap = _vmem_capacity_bytes()
    budget = int(cap * 0.65)            # headroom for compiler scratch / spill
    hw_lane = _round_up(HW, _LANE)      # lane padding of the x tile in VMEM
    pc_lane = _round_up(pcols, _LANE)   # conservative lane padding of outputs

    def block_bytes(tm, tk_lane, p_bufs):
        return (2 * tm * tk_lane * itemsize                               # x (2 bufs)
                + p_bufs * _round_up(tk_lane, _SUBLANE) * pc_lane * itemsize  # P
                + 2 * tm * pc_lane * itemsize                             # out (2 bufs)
                + tm * pc_lane * 4)                                       # f32 acc

    rows_ref = min(512, max(_SUBLANE, _round_up(NC, _SUBLANE)))

    # Prefer the whole reduction in one block; K-tile only if a ~512-row tile
    # over the full HW would blow the budget (e.g. H=W=224 on v7x).
    if block_bytes(rows_ref, hw_lane, 1) <= budget:
        tk, num_k = HW, 1
    else:
        avail = budget - 2 * rows_ref * pc_lane * itemsize - rows_ref * pc_lane * 4
        per_col = 2 * rows_ref * itemsize + 2 * pc_lane * itemsize
        tk = max(_LANE, (avail // per_col) // _LANE * _LANE)
        tk = min(tk, hw_lane)
        num_k = pl.cdiv(HW, tk)
    p_bufs = 1 if num_k == 1 else 2
    tk_lane = _round_up(tk, _LANE)

    # Largest power-of-two row tile (>=256, <=4096) that fits the budget.
    tm = _MIN_TM
    while tm * 2 <= _MAX_TM and block_bytes(tm * 2, tk_lane, p_bufs) <= budget:
        tm *= 2
    if NC <= 2 * _MIN_TM:
        tm = min(tm, NC)     # tiny problem: one full-rows tile (always legal)
    else:
        # Keep >= ~4 steps on the parallel row axis (both v7x TCs get work and
        # the pipeline has something to overlap), never below _MIN_TM rows.
        tm = min(tm, max(_MIN_TM, _round_up(pl.cdiv(NC, 4), _MIN_TM)))

    vmem_limit = min(int(cap * 0.9),
                     max(32 << 20, block_bytes(tm, tk_lane, p_bufs) + (8 << 20)))
    return tm, tk, num_k, vmem_limit


def _spp_matmul_kernel(x_ref, p_ref, o_ref, acc_ref):
    # One MXU matmul per (row-tile, k-tile): (TM, TK) @ (TK, pcols), f32
    # accumulation in VMEM scratch.  Inputs are fed in their native dtype
    # (no upcast copy); the store happens once, on the last reduction step.
    k = pl.program_id(1)

    @pl.when(k == 0)
    def _():
        acc_ref[...] = jnp.zeros_like(acc_ref)

    acc_ref[...] += jnp.dot(x_ref[...], p_ref[...],
                            preferred_element_type=jnp.float32)

    @pl.when(k == pl.num_programs(1) - 1)
    def _():
        o_ref[...] = acc_ref[...].astype(o_ref.dtype)


@functools.partial(jax.jit, static_argnames=("bins",))
def layer_spp(x, bins=BINS):
    """Pallas SPP forward.  x: (N, C, H, W) [NCHW] -> (N, C * sum(b*b))."""
    N, C, H, W = x.shape
    nb = sum(b * b for b in bins)
    NC, HW = N * C, H * W

    # Output lane width: for small feature maps the padded writeback dominates
    # HBM traffic, so pad only to 32 lanes (masked store); otherwise keep a
    # fully lane-dense 128-wide store.
    pcols = _round_up(nb, 32) if HW <= 512 else _round_up(nb, _LANE)

    TM, TK, num_k, vmem_limit = _choose_tiles(NC, HW, pcols, x.dtype.itemsize)
    HW_total = TK * num_k

    # Lane-dense presentation: rows = (n, c) pairs, columns = flattened (h, w).
    x2d = x.reshape(NC, HW)
    P_np = _pool_matrix(H, W, bins, pcols)
    if HW_total != HW:
        # K-tiling path: zero-pad the reduction axis so every block is
        # in-bounds (zero rows of P contribute nothing to the means).
        x2d = jnp.pad(x2d, ((0, 0), (0, HW_total - HW)))
        P_np = np.pad(P_np, ((0, HW_total - HW), (0, 0)))
    # P in the input dtype: bf16 x bf16 -> f32 is MXU-native (no upcast copy).
    P = jnp.asarray(P_np, dtype=x.dtype)

    grid_m = pl.cdiv(NC, TM)
    grid = (grid_m, num_k)

    # P's block index is constant when there is no K-tiling: single-buffer it
    # so the unused second pipeline buffer's VMEM goes to a bigger TM instead.
    p_kwargs = dict(pipeline_mode=pl.Buffered(1)) if num_k == 1 else {}
    in_specs = [
        pl.BlockSpec((TM, TK), lambda m, k: (m, k)),
        pl.BlockSpec((TK, pcols), lambda m, k: (k, 0), **p_kwargs),
    ]

    cost = pl.CostEstimate(
        flops=2 * NC * HW_total * pcols,
        transcendentals=0,
        bytes_accessed=(NC * HW_total * x.dtype.itemsize
                        + grid_m * HW_total * pcols * x.dtype.itemsize
                        + NC * pcols * x.dtype.itemsize),
    )

    pooled = pl.pallas_call(
        _spp_matmul_kernel,
        out_shape=jax.ShapeDtypeStruct((NC, pcols), x.dtype),
        grid=grid,
        in_specs=in_specs,
        out_specs=pl.BlockSpec((TM, pcols), lambda m, k: (m, 0)),
        scratch_shapes=[pltpu.VMEM((TM, pcols), jnp.float32)],
        compiler_params=pltpu.CompilerParams(
            dimension_semantics=("parallel", "arbitrary"),
            vmem_limit_bytes=vmem_limit),
        cost_estimate=cost,
    )(x2d, P)

    # Layout plumbing only: drop zero-pad columns and reorder to PyTorch's
    # torch.cat([flatten(pool_b(x), -3, -1)]) ordering (col = c*b*b + i*b + j).
    pooled = pooled[:, :nb].reshape(N, C, nb)
    chunks, off = [], 0
    for b in bins:
        bb = b * b
        chunks.append(pooled[:, :, off:off + bb].reshape(N, C * bb))
        off += bb
    return jnp.concatenate(chunks, axis=-1)


def layer_spp_ref(x, bins=BINS):
    """Pure-JAX reference (mirrors PyTorch AdaptiveAvgPool2d + flatten + cat)."""
    N, C, H, W = x.shape
    chunks = []
    for b in bins:
        pooled = jnp.zeros((N, C, b, b), jnp.float32)
        for i in range(b):
            hs, he = (i * H) // b, ((i + 1) * H + b - 1) // b
            for j in range(b):
                ws, we = (j * W) // b, ((j + 1) * W + b - 1) // b
                pooled = pooled.at[:, :, i, j].set(
                    jnp.mean(x[:, :, hs:he, ws:we].astype(jnp.float32),
                             axis=(-2, -1)))
        chunks.append(pooled.reshape(N, C * b * b).astype(x.dtype))
    return jnp.concatenate(chunks, axis=-1)


if __name__ == "__main__":
    key = jax.random.PRNGKey(0)
    x = jax.random.normal(key, (2, 4, 16, 16), dtype=jnp.float32)

    out = jax.block_until_ready(layer_spp(x))
    ref = layer_spp_ref(x)

    assert out.shape == (2, 4 * (1 + 4 + 16)), out.shape
    assert jnp.allclose(out, ref, atol=1e-5, rtol=1e-5), "mismatch vs reference"

    print("KERNEL_OK")
</pallas_src>

<mosaic_0001>
module attributes {stable_mosaic.version = 11 : i64} {
  func.func @_spp_matmul_kernel(%arg0: i32, %arg1: i32, %arg2: memref<8x256xf32, #tpu.memory_space<vmem>>, %arg3: memref<256x32xf32, #tpu.memory_space<vmem>>, %arg4: memref<8x32xf32, #tpu.memory_space<vmem>>, %arg5: memref<8x32xf32, #tpu.memory_space<vmem>>) attributes {dimension_semantics = [#tpu.dimension_semantics<parallel>, #tpu.dimension_semantics<arbitrary>], iteration_bounds = array<i64: 1, 1>, scalar_prefetch = 0 : i64, scratch_operands = 1 : i64, tpu.core_type = #tpu.core_type<tc>, window_params = [{transform_indices = @transform_0, window_bounds = array<i64: 8, 256>}, {pipeline_mode = #tpu.pipeline_mode<synchronous>, transform_indices = @transform_1, window_bounds = array<i64: 256, 32>}, {transform_indices = @transform_2, window_bounds = array<i64: 8, 32>}]} {
    %c0_i32 = arith.constant 0 : i32
    %0 = arith.cmpi eq, %arg1, %c0_i32 : i32
    %1 = arith.extui %0 : i1 to i32
    %c0_i32_0 = arith.constant 0 : i32
    %2 = arith.cmpi ne, %1, %c0_i32_0 : i32
    scf.if %2 {
      %cst_10 = arith.constant 0.000000e+00 : f32
      %12 = vector.broadcast %cst_10 : f32 to vector<8x32xf32>
      %c0_11 = arith.constant 0 : index
      %c0_12 = arith.constant 0 : index
      %13 = vector.load %arg5[%c0_11, %c0_12] : memref<8x32xf32, #tpu.memory_space<vmem>>, vector<8x32xf32>
      tpu.vector_store %arg5[%c0_11, %c0_12], %12 {strides = array<i32>} : memref<8x32xf32, #tpu.memory_space<vmem>>, vector<8x32xf32>,
    } else {
    }
    %c0 = arith.constant 0 : index
    %c0_1 = arith.constant 0 : index
    %3 = vector.load %arg5[%c0, %c0_1] : memref<8x32xf32, #tpu.memory_space<vmem>>, vector<8x32xf32>
    %c0_2 = arith.constant 0 : index
    %c0_3 = arith.constant 0 : index
    %4 = vector.load %arg2[%c0_2, %c0_3] : memref<8x256xf32, #tpu.memory_space<vmem>>, vector<8x256xf32>
    %c0_4 = arith.constant 0 : index
    %c0_5 = arith.constant 0 : index
    %5 = vector.load %arg3[%c0_4, %c0_5] : memref<256x32xf32, #tpu.memory_space<vmem>>, vector<256x32xf32>
    %cst = arith.constant dense<0.000000e+00> : vector<8x32xf32>
    %6 = tpu.matmul %4, %5, %cst {dimension_numbers = #tpu.dot_dimension_numbers<[1], [0], [0], [1], [0, 0, 1, 1], [], []>} : vector<8x256xf32>, vector<256x32xf32>, vector<8x32xf32> -> vector<8x32xf32>
    %7 = arith.addf %3, %6 : vector<8x32xf32>
    %c0_6 = arith.constant 0 : index
    %c0_7 = arith.constant 0 : index
    %8 = vector.load %arg5[%c0_6, %c0_7] : memref<8x32xf32, #tpu.memory_space<vmem>>, vector<8x32xf32>
    tpu.vector_store %arg5[%c0_6, %c0_7], %7 {strides = array<i32>} : memref<8x32xf32, #tpu.memory_space<vmem>>, vector<8x32xf32>,
    %c0_i32_8 = arith.constant 0 : i32
    %9 = arith.cmpi eq, %arg1, %c0_i32_8 : i32
    %10 = arith.extui %9 : i1 to i32
    %c0_i32_9 = arith.constant 0 : i32
    %11 = arith.cmpi ne, %10, %c0_i32_9 : i32
    scf.if %11 {
      %c0_10 = arith.constant 0 : index
      %c0_11 = arith.constant 0 : index
      %12 = vector.load %arg5[%c0_10, %c0_11] : memref<8x32xf32, #tpu.memory_space<vmem>>, vector<8x32xf32>
      %c0_12 = arith.constant 0 : index
      %c0_13 = arith.constant 0 : index
      %13 = vector.load %arg4[%c0_12, %c0_13] : memref<8x32xf32, #tpu.memory_space<vmem>>, vector<8x32xf32>
      tpu.vector_store %arg4[%c0_12, %c0_13], %12 {strides = array<i32>} : memref<8x32xf32, #tpu.memory_space<vmem>>, vector<8x32xf32>,
    } else {
    }
    return
  }
  func.func @transform_0(%arg0: i32, %arg1: i32) -> (i32, i32) {
    %c0_i32 = arith.constant 0 : i32
    return %arg0, %arg1 : i32, i32
  }
  func.func @transform_1(%arg0: i32, %arg1: i32) -> (i32, i32) {
    %c0_i32 = arith.constant 0 : i32
    %c0_i32_0 = arith.constant 0 : i32
    return %arg1, %c0_i32 : i32, i32
  }
  func.func @transform_2(%arg0: i32, %arg1: i32) -> (i32, i32) {
    %c0_i32 = arith.constant 0 : i32
    %c0_i32_0 = arith.constant 0 : i32
    return %arg0, %c0_i32 : i32, i32
  }
}

</mosaic_0001>

<bundles_post_ra>
// kernel: layer_spp.1
= control target key start
LH: loop header
LB: loop body
LE: loop exit
PB: predicated region body
PF: predicated region fallthrough
CT: control target
= control target key end

     0   :  { %7 = vsyncpa [#allocation4], 0  ;;  %s244_s9 = smov [#allocation3]   ;;  %s284_s0 = inlined_call_operand.vmem [shape: f32[8,256], index: 0, kind: input, shape index: {}]   ;;  %s285_s1 = inlined_call_operand.hbm [shape: f32[256,32], index: 1, kind: input, shape index: {}]   ;;  %s286_s2 = inlined_call_operand.vmem [shape: f32[8,32], index: 2, kind: output, shape index: {}]  }
   0x1   :  { %s15_s10 = sshll.u32 %s244_s9, 4  ;;  %s220_s13 = scalar_lea.hbm %s285_s1, 4096  ;;  %s16_s10 = int_to_ptr.vmem [resolvable:$true] %s15_s10 }
   0x2   :  { %p221_p0 = scmp.ne.s32.totalorder %s285_s1, %s220_s13  ;;  %p224_p1 = scmp.lt.u32.totalorder %s220_s13, %s285_s1 }
   0x4   :  { %p226_p2 = pnand %p224_p1, %p221_p0 }
   0x6   :  { %229 = shalt.err (!%p226_p2)
}
   0x7   :  { %s230_s18 = scalar_lea.vmem %s16_s10, 4096  ;;  %p235_p4 = scmp.lt.s32.totalorder %s16_s10, %s16_s10 }
   0x8   :  { %p231_p3 = scmp.ne.s32.totalorder %s16_s10, %s230_s18  ;;  %p236_p5 = scmp.lt.s32.totalorder %s230_s18, %s230_s18 }
   0xa   :  { %p237_p6 = por %p236_p5, %p235_p4 }
   0xc   :  { %p238_p7 = pnand %p237_p6, %p231_p3 }
   0xe   :  { %241 = shalt.err (!%p238_p7)
}
   0xf   :  { %s245_s19 = smov 128   ;;  %s246_s20 = smov 8  }
  0x10   :  { %21 = dma.hbm_to_vmem [thread:$0]  %s285_s1, 4096, %s16_s10, [#allocation4], %s245_s19, %s245_s19, %s246_s20  }
  0x11   :  { %242 = dma.done.wait [#allocation4], 4096  }
  0x12   :  { %243 = vsyncadd [#allocation4], 4294963200  ;;  %v50_v0 = vld [vmem:[#allocation3 + $0x80] sm:$0xff]  ;;  %v51_v1 = vld [vmem:[#allocation3 + $0x88] sm:$0xff]  ;;  %vm29_vm0 = vcmask 261120   ;;  %v247_v50 = vmov 0.0  }
  0x13   :  { %v34_v2 = vld [vmem:[#allocation3] sm:$0xff]  ;;  %v184_v3 = vpack.c.bf16 %v51_v1, %v50_v0  ;;  %v35_v4 = vld [vmem:[#allocation3 + $0x8] sm:$0xff]  ;;  %v52_v5 = vld [vmem:[#allocation3 + $0x90] sm:$0xff]  ;;  %30 = vst.msk [vmem:[#allocation2] sm:$0xff] %vm29_vm0, %v247_v50 }
  0x14   :  { %v53_v6 = vld [vmem:[#allocation3 + $0x98] sm:$0xff]  ;;  %v186_v7 = vpack.c.bf16 %v35_v4, %v34_v2  ;;  %v36_v9 = vld [vmem:[#allocation3 + $0x10] sm:$0xff]  ;;  %v54_v11 = vld [vmem:[#allocation3 + $0xa0] sm:$0xff] }
  0x15   :  { %v188_v8 = vpack.c.bf16 %v53_v6, %v52_v5  ;;  %v37_v10 = vld [vmem:[#allocation3 + $0x18] sm:$0xff]  ;;  %185 = vmatprep.subr.bf16.mxu0 %v184_v3  ;;  %v55_v12 = vld [vmem:[#allocation3 + $0xa8] sm:$0xff]  ;;  %v38_v15 = vld [vmem:[#allocation3 + $0x20] sm:$0xff] }
  0x16   :  { %187 = vmatpush3.bf16.msra.mxu0 %v186_v7  ;;  %v190_v13 = vpack.c.bf16 %v37_v10, %v36_v9  ;;  %v192_v14 = vpack.c.bf16 %v55_v12, %v54_v11  ;;  %v39_v16 = vld [vmem:[#allocation3 + $0x28] sm:$0xff]  ;;  %v56_v17 = vld [vmem:[#allocation3 + $0xb0] sm:$0xff]  ;;  %v57_v18 = vld [vmem:[#allocation3 + $0xb8] sm:$0xff] }
  0x17   :  { %189 = vmatprep.subr.bf16.mxu0 %v188_v8  ;;  %v194_v19 = vpack.c.bf16 %v39_v16, %v38_v15  ;;  %v196_v20 = vpack.c.bf16 %v57_v18, %v56_v17  ;;  %v40_v21 = vld [vmem:[#allocation3 + $0x30] sm:$0xff]  ;;  %v41_v22 = vld [vmem:[#allocation3 + $0x38] sm:$0xff]  ;;  %v58_v23 = vld [vmem:[#allocation3 + $0xc0] sm:$0xff] }
  0x18   :  { %v59_v24 = vld [vmem:[#allocation3 + $0xc8] sm:$0xff]  ;;  %v33_v25 = vld [vmem:[%s284_s0 + $0x8] sm:$0xff]  ;;  %v198_v26 = vpack.c.bf16 %v41_v22, %v40_v21  ;;  %v60_v30 = vld [vmem:[#allocation3 + $0xd0] sm:$0xff] }
  0x19   :  { %130 = vmatprep.mubr.f32.mxu0 %v33_v25  ;;  %v200_v27 = vpack.c.bf16 %v59_v24, %v58_v23  ;;  %v42_v28 = vld [vmem:[#allocation3 + $0x40] sm:$0xff]  ;;  %v43_v29 = vld [vmem:[#allocation3 + $0x48] sm:$0xff]  ;;  %v61_v31 = vld [vmem:[#allocation3 + $0xd8] sm:$0xff] }
  0x1a   :  { %191 = vmatpush3.bf16.msra.mxu0 %v190_v13  ;;  %v202_v32 = vpack.c.bf16 %v43_v29, %v42_v28  ;;  %v204_v33 = vpack.c.bf16 %v61_v31, %v60_v30  ;;  %v44_v34 = vld [vmem:[#allocation3 + $0x50] sm:$0xff]  ;;  %v45_v35 = vld [vmem:[#allocation3 + $0x58] sm:$0xff]  ;;  %v62_v36 = vld [vmem:[#allocation3 + $0xe0] sm:$0xff] }
  0x1b   :  { %193 = vmatprep.subr.bf16.mxu0 %v192_v14  ;;  %v63_v37 = vld [vmem:[#allocation3 + $0xe8] sm:$0xff]  ;;  %v206_v38 = vpack.c.bf16 %v45_v35, %v44_v34  ;;  %v46_v40 = vld [vmem:[#allocation3 + $0x60] sm:$0xff]  ;;  %v64_v42 = vld [vmem:[#allocation3 + $0xf0] sm:$0xff] }
  0x1c   :  { %v208_v39 = vpack.c.bf16 %v63_v37, %v62_v36  ;;  %v47_v41 = vld [vmem:[#allocation3 + $0x68] sm:$0xff]  ;;  %v65_v43 = vld [vmem:[#allocation3 + $0xf8] sm:$0xff]  ;;  %v48_v46 = vld [vmem:[#allocation3 + $0x70] sm:$0xff] }
  0x1d   :  { %v210_v44 = vpack.c.bf16 %v47_v41, %v46_v40  ;;  %v212_v45 = vpack.c.bf16 %v65_v43, %v64_v42  ;;  %v49_v47 = vld [vmem:[#allocation3 + $0x78] sm:$0xff] }
  0x1e   :  { %195 = vmatpush3.bf16.msra.mxu0 %v194_v19  ;;  %v214_v48 = vpack.c.bf16 %v49_v47, %v48_v46  ;;  %v32_v49 = vld [vmem:[%s284_s0] sm:$0xff] }
  0x1f   :  { %197 = vmatprep.subr.bf16.mxu0 %v196_v20  ;;  %v31_v52 = vld [vmem:[#allocation2] sm:$0xff] }
  0x22   :  { %199 = vmatpush3.bf16.msra.mxu0 %v198_v26 }
  0x23   :  { %201 = vmatprep.subr.bf16.mxu0 %v200_v27 }
  0x26   :  { %203 = vmatpush3.bf16.msra.mxu0 %v202_v32 }
  0x27   :  { %205 = vmatprep.subr.bf16.mxu0 %v204_v33 }
  0x2a   :  { %207 = vmatpush3.bf16.msra.mxu0 %v206_v38 }
  0x2b   :  { %209 = vmatprep.subr.bf16.mxu0 %v208_v39 }
  0x2e   :  { %211 = vmatpush3.bf16.msra.mxu0 %v210_v44 }
  0x2f   :  { %213 = vmatprep.subr.bf16.mxu0 %v212_v45 }
  0x32   :  { %215 = vmatpush3.bf16.msra.mxu0 %v214_v48 }
  0x35   :  { %131 = vmatmul.mubr.f32.vlgmr.msra.gmra.mrb[0].mxu0 %v32_v49 }
 0x108   :  { %v181_v51 = vpop.f32.mrb[0].mxu0 }
 0x109   :  { %v182_v53 = vpop.f32.mrb[1].mxu0 }
 0x10a   :  { %v183_v54 = vadd.f32 %v182_v53, %v181_v51 }
 0x10c   :  { %v136_v55 = vadd.f32 %v183_v54, %v31_v52 }
 0x10e   :  { %138 = vst.msk [vmem:[#allocation2] sm:$0xff] %vm29_vm0, %v136_v55 }
 0x115   :  { %v142_v56 = vld [vmem:[#allocation2] sm:$0xff] }
 0x116   :  { %143 = vst.msk [vmem:[%s286_s2] sm:$0xff] %vm29_vm0, %v142_v56 }
 0x117   :  { %148 = vsyncpa [#allocation4], 1 }

</bundles_post_ra>
